<compile_context>
chip_gen: v7x
topology: tpu7x:2x2x1
jax: 0.10.0
libtpu: 0.0.40
codegen_flags: <defaults>
</compile_context>

<pallas_src>
import typing

import numpy as np

import jax
import jax.numpy as jnp
from jax.experimental import pallas as pl
from jax.experimental.pallas import tpu as pltpu


# ----------------------------------------------------------------------------
# Demo Pallas kernel: whole-array HBM -> HBM DMA copy (module has no math).
# ----------------------------------------------------------------------------
def _dma_copy_kernel(x_hbm_ref, o_hbm_ref, sem):
    # Single full-array DMA: HBM -> HBM, no VMEM staging, no TC compute.
    cp = pltpu.make_async_copy(x_hbm_ref, o_hbm_ref, sem)
    cp.start()
    cp.wait()


def pallas_copy(x: jax.Array) -> jax.Array:
    """Device-side copy of `x` via one whole-array DMA (no tiling, no grid)."""
    return pl.pallas_call(
        _dma_copy_kernel,
        out_shape=jax.ShapeDtypeStruct(x.shape, x.dtype),
        in_specs=[pl.BlockSpec(memory_space=pl.ANY)],
        out_specs=pl.BlockSpec(memory_space=pl.ANY),
        scratch_shapes=[pltpu.SemaphoreType.DMA],
    )(x)


_pallas_copy_jit = jax.jit(pallas_copy)


# ----------------------------------------------------------------------------
# Faithful port of TestModule
# ----------------------------------------------------------------------------
class TestModule:
    """JAX port of the PyTorch TestModule (no parameters, no tensor I/O)."""

    def forward(self) -> typing.Optional[int]:
        # Exactly mirrors: return self.callee(None)
        return self.callee(None)

    def callee(self, o: typing.Optional[int]) -> typing.Optional[int]:
        # TODO(synk): Optional[int] pass-through is pure Python control flow;
        # there is no Pallas-representable compute here.
        return o


if __name__ == "__main__":
    # Faithful forward pass: must return None, like the PyTorch module.
    mod = TestModule()
    result = mod.forward()
    assert result is None, f"expected None, got {result!r}"

    # Exercise the demo Pallas DMA-copy kernel once so the script touches TPU.
    key = jax.random.PRNGKey(0)
    x = jax.random.normal(key, (256, 128), dtype=jnp.float32)
    x_host = np.asarray(jax.device_get(x))

    y = _pallas_copy_jit(x)
    jax.block_until_ready(y)
    assert np.array_equal(np.asarray(jax.device_get(y)), x_host), (
        "DMA copy kernel mismatch"
    )

    print("KERNEL_OK")
</pallas_src>

<mosaic_0001>
module attributes {stable_mosaic.version = 11 : i64} {
  func.func @_dma_copy_kernel(%arg0: memref<256x128xf32, #tpu.memory_space<any>>, %arg1: memref<256x128xf32, #tpu.memory_space<any>>, %arg2: memref<!tpu.dma_semaphore, #tpu.memory_space<semaphore_mem>>) attributes {dimension_semantics = [], scalar_prefetch = 0 : i64, scratch_operands = 1 : i64, tpu.core_type = #tpu.core_type<tc>} {
    tpu.enqueue_dma source(%arg0 : memref<256x128xf32, #tpu.memory_space<any>>) target(%arg1 : memref<256x128xf32, #tpu.memory_space<any>>) target_semaphore(%arg2 : memref<!tpu.dma_semaphore, #tpu.memory_space<semaphore_mem>>)
    tpu.wait_dma2 semaphore(%arg2 : memref<!tpu.dma_semaphore, #tpu.memory_space<semaphore_mem>>) src(%arg0 : memref<256x128xf32, #tpu.memory_space<any>>) dst(%arg1 : memref<256x128xf32, #tpu.memory_space<any>>)
    return
  }
}

</mosaic_0001>

<bundles_post_ra>
// kernel: pallas_copy.1
= control target key start
LH: loop header
LB: loop body
LE: loop exit
PB: predicated region body
PF: predicated region fallthrough
CT: control target
= control target key end

     0   :  { %s34_s6 = smov [#allocation2]   ;;  %s35_s7 = smov [#allocation3]   ;;  %s53_s0 = inlined_call_operand.hbm [shape: f32[256,128], index: 0, kind: input, shape index: {}]   ;;  %s54_s1 = inlined_call_operand.hbm [shape: f32[256,128], index: 1, kind: output, shape index: {}]  }
   0x1   :  { %s36_s8 = smov 0  }
   0x2   :  { %18 = dma.general %s53_s0, 4096, %s54_s1, %s34_s6, %s35_s7, [#allocation4], %s36_s8, 0  }
   0x3   :  { %32 = dma.done.wait [#allocation2], 4096 }
   0x4   :  { %33 = vsyncadd [#allocation2], 4294963200 }
   0x5   :  { %22 = vsyncmov [#allocation2] }
   0x8   :  { %s23_s13 = vpop.sfrf %22 }
   0x9   :  { %p28_p0 = scmp.ne.s32.totalorder %s23_s13, 0 }
   0xb   :  { %27 = shalt.err (%p28_p0)  }

</bundles_post_ra>
